<compile_context>
chip_gen: v6e
topology: v6e:2x2x1
jax: 0.10.0
libtpu: 0.0.40
codegen_flags: <defaults>
</compile_context>

<pallas_src>
import jax
import jax.numpy as jnp
from jax.experimental import pallas as pl
from jax.experimental.pallas import tpu as pltpu


# ---------------------------------------------------------------------------
# Kernel
# ---------------------------------------------------------------------------
def _gcn_kernel(adj_ref, x_ref, w_ref, o_ref, xw_ref):
    # adj_ref: (bt, rt, N)        adjacency row strip (f32 or bf16)
    # x_ref:   (bt, N, Fin)       node features of the graphs in this tile
    # w_ref:   (Fin, Fp)          weight, Fp = Fout padded to 128 lanes
    # o_ref:   (bt, rt, Fp)       output strip
    # xw_ref:  (bt, N, Fp) VMEM   scratch holding inputs @ weight

    # Feature projection once per batch tile (r == 0); later row strips just
    # re-read the scratch -> no redundant MXU/VALU pass over x and w.
    @pl.when(pl.program_id(1) == 0)
    def _():
        x = x_ref[...]
        w = w_ref[...]
        bt, n_full, fin = x.shape
        fp = w.shape[-1]
        if n_full % 8 == 0:
            # One large-M matmul keeps the MXU pipeline full.
            xw = jnp.dot(x.reshape(bt * n_full, fin), w,
                         preferred_element_type=jnp.float32)
            xw_ref[...] = xw.reshape(bt, n_full, fp)
        else:
            xw_ref[...] = jnp.einsum('bnf,fo->bno', x, w,
                                     preferred_element_type=jnp.float32)

    adj = adj_ref[...]
    if adj.dtype != jnp.float32:
        # bf16 adjacency (exact for 0/1 entries) -> exact f32 upcast.
        adj = adj.astype(jnp.float32)

    # Aggregate: y = A_strip @ XW (no NxN identity / scaled-adj temporaries).
    y = jnp.einsum('brn,bnf->brf', adj, xw_ref[...],
                   preferred_element_type=jnp.float32)

    # Degree of each row in the strip: rowsum(adj + I) == rowsum(adj) + 1.
    deg = jnp.sum(adj, axis=-1, keepdims=True) + 1.0          # (bt, rt, 1)
    # Scale the small (rt, Fp) result instead of the NxN adjacency.
    # approx=False keeps bit-level agreement with the 1e-5 reference check.
    y = y * pl.reciprocal(deg, approx=False)

    o_ref[...] = jnp.tanh(y).astype(o_ref.dtype)


# ---------------------------------------------------------------------------
# Hardware-aware tiling heuristics
# ---------------------------------------------------------------------------
def _vmem_capacity_bytes():
    try:
        cap = getattr(pltpu.get_tpu_info(), "vmem_capacity_bytes", None)
        if cap:
            return int(cap)
    except Exception:
        pass
    try:
        kind = jax.devices()[0].device_kind.lower()
    except Exception:
        kind = ""
    if "v7" in kind:
        return 64 << 20
    if "v5" in kind or "v6" in kind:
        return 128 << 20
    return 64 << 20  # conservative default


def _mxu_m_align():
    try:
        kind = jax.devices()[0].device_kind.lower()
    except Exception:
        kind = ""
    # v5e MXU is 128-wide; v6e / v7x MXUs are 256-wide.
    return 128 if "v5" in kind else 256


def _divisors_desc(n):
    return [d for d in range(n, 0, -1) if n % d == 0]


def _block_footprint_bytes(bt, rt, N, Fin, Fout_pad, adj_itemsize):
    """Resident VMEM bytes for one grid step (default double-buffering)."""
    return (2 * bt * rt * N * adj_itemsize      # adj row strip
            + 2 * bt * N * Fin * 4              # x
            + 2 * Fin * Fout_pad * 4            # weight
            + 2 * bt * rt * Fout_pad * 4        # output strip
            + bt * N * Fout_pad * 4)            # xw scratch (single buffer)


def _default_tiles(B, N, Fin, Fout_pad, adj_itemsize, vmem_cap, mxu_m):
    budget = int(0.70 * vmem_cap)

    def fits(bt, rt):
        return _block_footprint_bytes(bt, rt, N, Fin, Fout_pad,
                                      adj_itemsize) <= budget

    # Row tile: largest divisor of N that is N itself or MXU-M aligned
    # (256 on v6e/v7x, 128 on v5e; fall back to sublane multiples of 8)
    # whose single-graph footprint fits the VMEM budget.
    row_tile = None
    for align in (mxu_m, 8):
        for rt in _divisors_desc(N):
            if (rt == N or rt % align == 0) and fits(1, rt):
                row_tile = rt
                break
        if row_tile is not None:
            break
    if row_tile is None:
        row_tile = N  # awkward N / tiny budget: let the compiler cope

    # Batch tile: largest divisor of B whose footprint still fits.
    batch_tile = 1
    for bt in _divisors_desc(B):
        if fits(bt, row_tile):
            batch_tile = bt
            break

    # Megacore (v7x): r is "arbitrary", so only the b axis can be split
    # across TensorCores. Keep >= 2 b steps if that still leaves a healthy
    # amount of work per step (amortize ~0.35us/step overhead).
    if B // batch_tile < 2:
        for bt in _divisors_desc(B):
            if bt < batch_tile and B // bt >= 2 and bt * row_tile >= 512:
                batch_tile = bt
                break

    return batch_tile, row_tile


# ---------------------------------------------------------------------------
# Wrapper
# ---------------------------------------------------------------------------
def graph_conv_sparse(adj, inputs, weight, *,
                      batch_tile=None, row_tile=None,
                      adj_in_bf16=False, vmem_limit_bytes=None,
                      return_padded=False):
    """GraphConvSparse forward: tanh((1/(rowsum(A)+1)) * A @ (X @ W)).

    adj: (B,N,N), inputs: (B,N,Fin), weight: (Fin,Fout) -> (B,N,Fout).
    adj_in_bf16: ship adjacency as bf16 (exact for 0/1 adjacencies); halves
    the dominant HBM stream, kernel upcasts to f32 so results are unchanged.
    """
    B, N, _ = adj.shape
    Fin = inputs.shape[-1]
    Fout = weight.shape[-1]

    # Lane-dense output: pad Fout up to a multiple of 128 (zero columns ->
    # tanh(0) = 0, sliced off after the call unless return_padded=True).
    Fout_pad = max(128, ((Fout + 127) // 128) * 128)
    if Fout_pad != Fout:
        w_call = jnp.zeros((Fin, Fout_pad), weight.dtype).at[:, :Fout].set(weight)
    else:
        w_call = weight

    adj_call = adj.astype(jnp.bfloat16) if adj_in_bf16 else adj
    adj_itemsize = jnp.dtype(adj_call.dtype).itemsize

    vmem_cap = _vmem_capacity_bytes()
    mxu_m = _mxu_m_align()
    auto_bt, auto_rt = _default_tiles(B, N, Fin, Fout_pad, adj_itemsize,
                                      vmem_cap, mxu_m)
    if batch_tile is None:
        batch_tile = auto_bt
    if row_tile is None:
        row_tile = auto_rt

    # Fail fast on invalid overrides (Mosaic's (8,128)/(16,128) block
    # constraints otherwise produce opaque lowering errors).
    if B % batch_tile != 0:
        raise ValueError(f"batch_tile={batch_tile} must divide B={B}")
    if N % row_tile != 0:
        raise ValueError(f"row_tile={row_tile} must divide N={N}")
    sublane = 16 if adj_call.dtype == jnp.bfloat16 else 8
    if row_tile != N and row_tile % sublane != 0:
        raise ValueError(f"row_tile={row_tile} must be a multiple of "
                         f"{sublane} (adj dtype {adj_call.dtype}) or == N={N}")

    grid = (B // batch_tile, N // row_tile)

    if vmem_limit_bytes is None:
        fp = _block_footprint_bytes(batch_tile, row_tile, N, Fin, Fout_pad,
                                    adj_itemsize)
        vmem_limit_bytes = int(1.25 * fp) + (4 << 20)      # margin for Mosaic
        vmem_limit_bytes = max(vmem_limit_bytes, 32 << 20)
        vmem_limit_bytes = min(vmem_limit_bytes, vmem_cap - (2 << 20))

    cost = pl.CostEstimate(
        flops=2 * B * N * N * Fout_pad + 2 * B * N * Fin * Fout_pad,
        transcendentals=B * N * Fout_pad,                   # tanh
        bytes_accessed=(B * N * N * adj_itemsize + B * N * Fin * 4
                        + Fin * Fout_pad * 4 + B * N * Fout_pad * 4),
    )

    out_shape = jax.ShapeDtypeStruct((B, N, Fout_pad), inputs.dtype)

    def _call(single_buffer_constants):
        const_kwargs = {}
        if single_buffer_constants and hasattr(pl, "Buffered"):
            # x / weight are never re-fetched within a batch tile; a single
            # pipeline buffer halves their VMEM footprint.
            const_kwargs = dict(pipeline_mode=pl.Buffered(1))
        grid_spec = pltpu.PrefetchScalarGridSpec(
            num_scalar_prefetch=0,
            grid=grid,
            in_specs=[
                # adjacency row strip (changes every step -> default buffering)
                pl.BlockSpec((batch_tile, row_tile, N),
                             lambda b, r: (b, r, 0)),
                # node features for this batch tile (constant across r)
                pl.BlockSpec((batch_tile, N, Fin),
                             lambda b, r: (b, 0, 0), **const_kwargs),
                # weight (constant across the whole grid)
                pl.BlockSpec((Fin, Fout_pad),
                             lambda b, r: (0, 0), **const_kwargs),
            ],
            out_specs=pl.BlockSpec((batch_tile, row_tile, Fout_pad),
                                   lambda b, r: (b, r, 0)),
            scratch_shapes=[pltpu.VMEM((batch_tile, N, Fout_pad),
                                       jnp.float32)],
        )
        return pl.pallas_call(
            _gcn_kernel,
            out_shape=out_shape,
            grid_spec=grid_spec,
            cost_estimate=cost,
            compiler_params=pltpu.CompilerParams(
                # r re-uses the xw scratch written at r == 0 -> must stay
                # "arbitrary"; b is independent -> "parallel" (megacore).
                dimension_semantics=("parallel", "arbitrary"),
                vmem_limit_bytes=int(vmem_limit_bytes),
            ),
        )(adj_call, inputs, w_call)

    try:
        out = _call(True)
    except Exception:
        # Some JAX versions reject pl.Buffered(1) on top-level pallas_call
        # BlockSpecs; fall back to default double buffering.
        out = _call(False)

    if return_padded or Fout_pad == Fout:
        return out
    # TODO(synk): let fused consumers take the 128-padded layout directly to
    # avoid this extra full-array slice copy.
    return out[..., :Fout]


# ---------------------------------------------------------------------------
# Init + reference + demo
# ---------------------------------------------------------------------------
def glorot_init(key, input_dim, output_dim):
    init_range = jnp.sqrt(6.0 / (input_dim + output_dim))
    return jax.random.uniform(
        key, (input_dim, output_dim), dtype=jnp.float32,
        minval=-init_range, maxval=init_range,
    )


def _reference(adj, inputs, weight):
    B, N, _ = adj.shape
    eye = jnp.broadcast_to(jnp.eye(N, dtype=adj.dtype), (B, N, N))
    D = 1.0 / jnp.sum(adj + eye, axis=2)                 # (B, N)
    adj_norm = D[:, :, None] * adj
    x = jnp.matmul(inputs, weight)
    x = jnp.matmul(adj_norm, x)
    return jnp.tanh(x)


if __name__ == "__main__":
    key = jax.random.PRNGKey(0)
    k_adj, k_x, k_w = jax.random.split(key, 3)

    B, N, Fin, Fout = 2, 16, 8, 32

    # symmetric 0/1 adjacency (identity handled analytically in-kernel)
    a = jax.random.uniform(k_adj, (B, N, N))
    adj = (a + jnp.swapaxes(a, 1, 2) > 1.0).astype(jnp.float32)

    inputs = jax.random.normal(k_x, (B, N, Fin), dtype=jnp.float32)
    weight = glorot_init(k_w, Fin, Fout)

    # 0/1 adjacency -> bf16 shipping is lossless (kernel upcasts to f32).
    out = graph_conv_sparse(adj, inputs, weight, adj_in_bf16=True)
    out = jax.block_until_ready(out)

    ref = _reference(adj, inputs, weight)
    assert out.shape == (B, N, Fout)
    assert jnp.allclose(out, ref, atol=1e-5, rtol=1e-5), "mismatch vs reference"

    print("KERNEL_OK")
</pallas_src>

<mosaic_0001>
module attributes {stable_mosaic.version = 11 : i64} {
  func.func @_gcn_kernel(%arg0: i32, %arg1: i32, %arg2: memref<2x16x16xbf16, #tpu.memory_space<vmem>>, %arg3: memref<2x16x8xf32, #tpu.memory_space<vmem>>, %arg4: memref<8x128xf32, #tpu.memory_space<vmem>>, %arg5: memref<2x16x128xf32, #tpu.memory_space<vmem>>, %arg6: memref<2x16x128xf32, #tpu.memory_space<vmem>>) attributes {dimension_semantics = [#tpu.dimension_semantics<parallel>, #tpu.dimension_semantics<arbitrary>], iteration_bounds = array<i64: 1, 1>, scalar_prefetch = 0 : i64, scratch_operands = 1 : i64, tpu.core_type = #tpu.core_type<tc>, window_params = [{transform_indices = @transform_0, window_bounds = array<i64: 2, 16, 16>}, {pipeline_mode = #tpu.pipeline_mode<synchronous>, transform_indices = @transform_1, window_bounds = array<i64: 2, 16, 8>}, {pipeline_mode = #tpu.pipeline_mode<synchronous>, transform_indices = @transform_2, window_bounds = array<i64: 8, 128>}, {transform_indices = @transform_3, window_bounds = array<i64: 2, 16, 128>}]} {
    %c0_i32 = arith.constant 0 : i32
    %0 = arith.cmpi eq, %arg1, %c0_i32 : i32
    %1 = arith.extui %0 : i1 to i32
    %c0_i32_0 = arith.constant 0 : i32
    %2 = arith.cmpi ne, %1, %c0_i32_0 : i32
    scf.if %2 {
      %c0_11 = arith.constant 0 : index
      %c0_12 = arith.constant 0 : index
      %c0_13 = arith.constant 0 : index
      %16 = vector.load %arg3[%c0_11, %c0_12, %c0_13] : memref<2x16x8xf32, #tpu.memory_space<vmem>>, vector<2x16x8xf32>
      %c0_14 = arith.constant 0 : index
      %c0_15 = arith.constant 0 : index
      %17 = vector.load %arg4[%c0_14, %c0_15] : memref<8x128xf32, #tpu.memory_space<vmem>>, vector<8x128xf32>
      %18 = vector.shape_cast %16 : vector<2x16x8xf32> to vector<32x8xf32>
      %cst_16 = arith.constant dense<0.000000e+00> : vector<32x128xf32>
      %19 = tpu.matmul %18, %17, %cst_16 {dimension_numbers = #tpu.dot_dimension_numbers<[1], [0], [0], [1], [0, 0, 1, 1], [], []>} : vector<32x8xf32>, vector<8x128xf32>, vector<32x128xf32> -> vector<32x128xf32>
      %20 = vector.shape_cast %19 : vector<32x128xf32> to vector<2x16x128xf32>
      %c0_17 = arith.constant 0 : index
      %c0_18 = arith.constant 0 : index
      %c0_19 = arith.constant 0 : index
      %21 = vector.load %arg6[%c0_17, %c0_18, %c0_19] : memref<2x16x128xf32, #tpu.memory_space<vmem>>, vector<2x16x128xf32>
      tpu.vector_store %arg6[%c0_17, %c0_18, %c0_19], %20 {strides = array<i32>} : memref<2x16x128xf32, #tpu.memory_space<vmem>>, vector<2x16x128xf32>,
    } else {
    }
    %c0 = arith.constant 0 : index
    %c0_1 = arith.constant 0 : index
    %c0_2 = arith.constant 0 : index
    %3 = vector.load %arg2[%c0, %c0_1, %c0_2] : memref<2x16x16xbf16, #tpu.memory_space<vmem>>, vector<2x16x16xbf16>
    %4 = arith.extf %3 : vector<2x16x16xbf16> to vector<2x16x16xf32>
    %c0_3 = arith.constant 0 : index
    %c0_4 = arith.constant 0 : index
    %c0_5 = arith.constant 0 : index
    %5 = vector.load %arg6[%c0_3, %c0_4, %c0_5] : memref<2x16x128xf32, #tpu.memory_space<vmem>>, vector<2x16x128xf32>
    "tpu.trace_start"() <{level = 10 : i32, message = "brn,bnf->brf"}> : () -> ()
    %cst = arith.constant dense<0.000000e+00> : vector<2x16x128xf32>
    %6 = tpu.matmul %4, %5, %cst {dimension_numbers = #tpu.dot_dimension_numbers<[2], [1], [1], [2], [0, 0, 0, 1, 1, 2], [0], [0]>} : vector<2x16x16xf32>, vector<2x16x128xf32>, vector<2x16x128xf32> -> vector<2x16x128xf32>
    "tpu.trace_stop"() : () -> ()
    %cst_6 = arith.constant dense<0.000000e+00> : vector<2x16xf32>
    %7 = vector.multi_reduction <add>, %4, %cst_6 [2] : vector<2x16x16xf32> to vector<2x16xf32>
    %8 = vector.shape_cast %7 : vector<2x16xf32> to vector<2x16x1xf32>
    %cst_7 = arith.constant 1.000000e+00 : f32
    %9 = vector.broadcast %cst_7 : f32 to vector<2x16x1xf32>
    %10 = arith.addf %8, %9 : vector<2x16x1xf32>
    %11 = tpu.reciprocal %10 : vector<2x16x1xf32> -> vector<2x16x1xf32>
    %12 = vector.broadcast %11 : vector<2x16x1xf32> to vector<2x16x128xf32>
    %13 = arith.mulf %6, %12 : vector<2x16x128xf32>
    %14 = math.tanh %13 : vector<2x16x128xf32>
    %c0_8 = arith.constant 0 : index
    %c0_9 = arith.constant 0 : index
    %c0_10 = arith.constant 0 : index
    %15 = vector.load %arg5[%c0_8, %c0_9, %c0_10] : memref<2x16x128xf32, #tpu.memory_space<vmem>>, vector<2x16x128xf32>
    tpu.vector_store %arg5[%c0_8, %c0_9, %c0_10], %14 {strides = array<i32>} : memref<2x16x128xf32, #tpu.memory_space<vmem>>, vector<2x16x128xf32>,
    return
  }
  func.func @transform_0(%arg0: i32, %arg1: i32) -> (i32, i32, i32) {
    %c0_i32 = arith.constant 0 : i32
    %c0_i32_0 = arith.constant 0 : i32
    return %arg0, %arg1, %c0_i32 : i32, i32, i32
  }
  func.func @transform_1(%arg0: i32, %arg1: i32) -> (i32, i32, i32) {
    %c0_i32 = arith.constant 0 : i32
    %c0_i32_0 = arith.constant 0 : i32
    %c0_i32_1 = arith.constant 0 : i32
    return %arg0, %c0_i32, %c0_i32_0 : i32, i32, i32
  }
  func.func @transform_2(%arg0: i32, %arg1: i32) -> (i32, i32) {
    %c0_i32 = arith.constant 0 : i32
    %c0_i32_0 = arith.constant 0 : i32
    %c0_i32_1 = arith.constant 0 : i32
    return %c0_i32, %c0_i32_0 : i32, i32
  }
  func.func @transform_3(%arg0: i32, %arg1: i32) -> (i32, i32, i32) {
    %c0_i32 = arith.constant 0 : i32
    %c0_i32_0 = arith.constant 0 : i32
    return %arg0, %arg1, %c0_i32 : i32, i32, i32
  }
}

module attributes {stable_mosaic.version = 11 : i64} {
  func.func @_gcn_kernel(%arg0: i32, %arg1: i32, %arg2: memref<2x16x16xbf16, #tpu.memory_space<vmem>>, %arg3: memref<2x16x8xf32, #tpu.memory_space<vmem>>, %arg4: memref<8x128xf32, #tpu.memory_space<vmem>>, %arg5: memref<2x16x128xf32, #tpu.memory_space<vmem>>, %arg6: memref<2x16x128xf32, #tpu.memory_space<vmem>>) attributes {dimension_semantics = [#tpu.dimension_semantics<parallel>, #tpu.dimension_semantics<arbitrary>], iteration_bounds = array<i64: 1, 1>, scalar_prefetch = 0 : i64, scratch_operands = 1 : i64, tpu.core_type = #tpu.core_type<tc>, window_params = [{transform_indices = @transform_0, window_bounds = array<i64: 2, 16, 16>}, {transform_indices = @transform_1, window_bounds = array<i64: 2, 16, 8>}, {pipeline_mode = #tpu.pipeline_mode<synchronous>, transform_indices = @transform_2, window_bounds = array<i64: 8, 128>}, {transform_indices = @transform_3, window_bounds = array<i64: 2, 16, 128>}]} {
    %c0_i32 = arith.constant 0 : i32
    %0 = arith.cmpi eq, %arg1, %c0_i32 : i32
    %1 = arith.extui %0 : i1 to i32
    %c0_i32_0 = arith.constant 0 : i32
    %2 = arith.cmpi ne, %1, %c0_i32_0 : i32
    scf.if %2 {
      %c0_11 = arith.constant 0 : index
      %c0_12 = arith.constant 0 : index
      %c0_13 = arith.constant 0 : index
      %16 = vector.load %arg3[%c0_11, %c0_12, %c0_13] : memref<2x16x8xf32, #tpu.memory_space<vmem>>, vector<2x16x8xf32>
      %c0_14 = arith.constant 0 : index
      %c0_15 = arith.constant 0 : index
      %17 = vector.load %arg4[%c0_14, %c0_15] : memref<8x128xf32, #tpu.memory_space<vmem>>, vector<8x128xf32>
      %18 = vector.shape_cast %16 : vector<2x16x8xf32> to vector<32x8xf32>
      %cst_16 = arith.constant dense<0.000000e+00> : vector<32x128xf32>
      %19 = tpu.matmul %18, %17, %cst_16 {dimension_numbers = #tpu.dot_dimension_numbers<[1], [0], [0], [1], [0, 0, 1, 1], [], []>} : vector<32x8xf32>, vector<8x128xf32>, vector<32x128xf32> -> vector<32x128xf32>
      %20 = vector.shape_cast %19 : vector<32x128xf32> to vector<2x16x128xf32>
      %c0_17 = arith.constant 0 : index
      %c0_18 = arith.constant 0 : index
      %c0_19 = arith.constant 0 : index
      %21 = vector.load %arg6[%c0_17, %c0_18, %c0_19] : memref<2x16x128xf32, #tpu.memory_space<vmem>>, vector<2x16x128xf32>
      tpu.vector_store %arg6[%c0_17, %c0_18, %c0_19], %20 {strides = array<i32>} : memref<2x16x128xf32, #tpu.memory_space<vmem>>, vector<2x16x128xf32>,
    } else {
    }
    %c0 = arith.constant 0 : index
    %c0_1 = arith.constant 0 : index
    %c0_2 = arith.constant 0 : index
    %3 = vector.load %arg2[%c0, %c0_1, %c0_2] : memref<2x16x16xbf16, #tpu.memory_space<vmem>>, vector<2x16x16xbf16>
    %4 = arith.extf %3 : vector<2x16x16xbf16> to vector<2x16x16xf32>
    %c0_3 = arith.constant 0 : index
    %c0_4 = arith.constant 0 : index
    %c0_5 = arith.constant 0 : index
    %5 = vector.load %arg6[%c0_3, %c0_4, %c0_5] : memref<2x16x128xf32, #tpu.memory_space<vmem>>, vector<2x16x128xf32>
    "tpu.trace_start"() <{level = 10 : i32, message = "brn,bnf->brf"}> : () -> ()
    %cst = arith.constant dense<0.000000e+00> : vector<2x16x128xf32>
    %6 = tpu.matmul %4, %5, %cst {dimension_numbers = #tpu.dot_dimension_numbers<[2], [1], [1], [2], [0, 0, 0, 1, 1, 2], [0], [0]>} : vector<2x16x16xf32>, vector<2x16x128xf32>, vector<2x16x128xf32> -> vector<2x16x128xf32>
    "tpu.trace_stop"() : () -> ()
    %cst_6 = arith.constant dense<0.000000e+00> : vector<2x16xf32>
    %7 = vector.multi_reduction <add>, %4, %cst_6 [2] : vector<2x16x16xf32> to vector<2x16xf32>
    %8 = vector.shape_cast %7 : vector<2x16xf32> to vector<2x16x1xf32>
    %cst_7 = arith.constant 1.000000e+00 : f32
    %9 = vector.broadcast %cst_7 : f32 to vector<2x16x1xf32>
    %10 = arith.addf %8, %9 : vector<2x16x1xf32>
    %11 = tpu.reciprocal %10 : vector<2x16x1xf32> -> vector<2x16x1xf32>
    %12 = vector.broadcast %11 : vector<2x16x1xf32> to vector<2x16x128xf32>
    %13 = arith.mulf %6, %12 : vector<2x16x128xf32>
    %14 = math.tanh %13 : vector<2x16x128xf32>
    %c0_8 = arith.constant 0 : index
    %c0_9 = arith.constant 0 : index
    %c0_10 = arith.constant 0 : index
    %15 = vector.load %arg5[%c0_8, %c0_9, %c0_10] : memref<2x16x128xf32, #tpu.memory_space<vmem>>, vector<2x16x128xf32>
    tpu.vector_store %arg5[%c0_8, %c0_9, %c0_10], %14 {strides = array<i32>} : memref<2x16x128xf32, #tpu.memory_space<vmem>>, vector<2x16x128xf32>,
    return
  }
  func.func @transform_0(%arg0: i32, %arg1: i32) -> (i32, i32, i32) {
    %c0_i32 = arith.constant 0 : i32
    %c0_i32_0 = arith.constant 0 : i32
    return %arg0, %arg1, %c0_i32 : i32, i32, i32
  }
  func.func @transform_1(%arg0: i32, %arg1: i32) -> (i32, i32, i32) {
    %c0_i32 = arith.constant 0 : i32
    %c0_i32_0 = arith.constant 0 : i32
    %c0_i32_1 = arith.constant 0 : i32
    return %arg0, %c0_i32, %c0_i32_0 : i32, i32, i32
  }
  func.func @transform_2(%arg0: i32, %arg1: i32) -> (i32, i32) {
    %c0_i32 = arith.constant 0 : i32
    %c0_i32_0 = arith.constant 0 : i32
    %c0_i32_1 = arith.constant 0 : i32
    return %c0_i32, %c0_i32_0 : i32, i32
  }
  func.func @transform_3(%arg0: i32, %arg1: i32) -> (i32, i32, i32) {
    %c0_i32 = arith.constant 0 : i32
    %c0_i32_0 = arith.constant 0 : i32
    return %arg0, %arg1, %c0_i32 : i32, i32, i32
  }
}

</mosaic_0001>

<bundles_post_ra>
// kernel: tpu_custom_call.1
= control target key start
LH: loop header
LB: loop body
LE: loop exit
PB: predicated region body
PF: predicated region fallthrough
CT: control target
= control target key end

     0   :  { %vm24_vm0 = vcmask 64512   ;;  %s497_s0 = inlined_call_operand.vmem [shape: bf16[2,16,16], index: 0, kind: input, shape index: {}]   ;;  %s498_s1 = inlined_call_operand.vmem [shape: f32[2,16,8], index: 1, kind: input, shape index: {}]   ;;  %s499_s2 = inlined_call_operand.vmem [shape: f32[8,128], index: 2, kind: input, shape index: {}]   ;;  %s500_s3 = inlined_call_operand.hbm [shape: f32[2,16,128], index: 3, kind: output, shape index: {}]  }
   0x1   :  { %v23_v0 = vld [vmem:[%s499_s2] sm:$0xff]  ;;  %v20_v2 = vld [vmem:[%s498_s1 + $0x8] sm:$0xff]  ;;  %v21_v3 = vld [vmem:[%s498_s1 + $0x10] sm:$0xff] }
   0x2   :  { %v19_v1 = vld [vmem:[%s498_s1] sm:$0xff]  ;;  %379 = vmatprep.subr.mxu0 %v23_v0 }
   0x3   :  { %381 = vmatprep.mubr.msk.f32.mxu0 %vm24_vm0, %v19_v1 }
   0x4   :  { %8 = vsyncpa [#allocation4], 0  ;;  %380 = vmatpush3.msra.mxu0 %v23_v0  ;;  %v22_v4 = vld [vmem:[%s498_s1 + $0x18] sm:$0xff]  ;;  %v358_v5 = vld [vmem:[%s497_s0] sm:$0xff]   ;;  %vm138_vm1 = vcmask 130048  }
   0x5   :  { %382 = vmatmul.mubr.msk.f32.vlgmr.msra.gmra.mxu0 %vm24_vm0, %v20_v2  ;;  %v359_v6 = vunpack.c.l.bf16 %v358_v5  ;;  %v365_v7 = vld [vmem:[%s497_s0 + $0x8] sm:$0xff]   ;;  %v360_v9 = vunpack.c.h.bf16 %v358_v5  ;;  %s442_s0 = smov [#allocation3]  }
   0x6   :  { %384 = vmatprep.mubr.msk.f32.mxu0 %vm24_vm0, %v21_v3  ;;  %v363_v8 = vunpack.c.l.bf16 %v365_v7  ;;  %v364_v10 = vunpack.c.h.bf16 %v365_v7  ;;  %s338_s1 = sshll.u32 %s442_s0, 4  ;;  %s339_s1 = int_to_ptr.vmem [resolvable:$true] %s338_s1 }
   0x7   :  { %391 = vmatprep.mubr.msk.f32.mxu1 %vm138_vm1, %v359_v6  ;;  %v301_v11 = vsel %vm138_vm1, %v359_v6, 0.0  ;;  %v304_v13 = vsel %vm138_vm1, %v360_v9, 0.0  ;;  %s420_s25 = scalar_lea.vmem %s339_s1, 512  ;;  %p425_p1 = scmp.lt.s32.totalorder %s339_s1, %s339_s1 }
   0x8   :  { %v307_v12 = vsel %vm138_vm1, %v363_v8, 0.0  ;;  %302 = vadd.xlane.f32.xlu0 %v301_v11  ;;  %v310_v14 = vsel %vm138_vm1, %v364_v10, 0.0  ;;  %p421_p0 = scmp.ne.s32.totalorder %s339_s1, %s420_s25  ;;  %p426_p2 = scmp.lt.s32.totalorder %s420_s25, %s420_s25 }
   0x9   :  { %385 = vmatmul.mubr.msk.f32.gmra.mxu0 %vm24_vm0, %v22_v4  ;;  %308 = vadd.xlane.f32.xlu1 %v307_v12 }
   0xa   :  { %p427_p3 = por %p426_p2, %p425_p1 }
   0xc   :  { %305 = vadd.xlane.f32.xlu0 %v304_v13  ;;  %p428_p4 = pnand %p427_p3, %p421_p0 }
   0xd   :  { %311 = vadd.xlane.f32.xlu1 %v310_v14 }
  0x91   :  { %v303_v19 = vpop.xlane.xlu0 %302 }
  0x92   :  { %v309_v20 = vpop.xlane.xlu1 %308  ;;  %v313_v24 = vadd.f32 1.0, %v303_v19 }
  0x93   :  { %v315_v26 = vadd.f32 1.0, %v309_v20 }
  0x95   :  { %v306_v21 = vpop.xlane.xlu0 %305 }
  0x96   :  { %v314_v22 = vadd.f32 1.0, %v306_v21  ;;  %v312_v23 = vpop.xlane.xlu1 %311 }
  0x97   :  { %v316_v25 = vadd.f32 1.0, %v312_v23 }
  0x98   :  { %404 = vrcp.f32 %v314_v22 }
  0x99   :  { %406 = vrcp.f32 %v313_v24 }
  0x9a   :  { %408 = vrcp.f32 %v316_v25 }
  0x9b   :  { %410 = vrcp.f32 %v315_v26 }
  0xa5   :  { %v405_v27 = vpop.eup %404 }
  0xa6   :  { %v407_v28 = vpop.eup %406 }
  0xa7   :  { %v409_v31 = vpop.eup %408 }
  0xa8   :  { %v411_v36 = vpop.eup %410 }
  0xc5   :  { %v383_v15 = vpop.f32.mrf.mxu0 }
  0xc6   :  { %387 = vmatprep.subr.mxu1 %v383_v15 }
  0xc7   :  { %v103_v16 = vpop.f32.mrf.mxu0  ;;  %388 = vmatpush3.msra.mxu1 %v383_v15 }
  0xc8   :  { %389 = vmatprep.subr.mxu1 %v103_v16 }
  0xc9   :  { %v386_v17 = vpop.f32.mrf.mxu0  ;;  %390 = vmatpush3.msra.mxu1 %v103_v16 }
  0xca   :  { %392 = vmatmul.mubr.msk.f32.vlgmr.msra.gmra.mxu1 %vm138_vm1, %v360_v9  ;;  %394 = vmatprep.subr.mxu1 %v386_v17 }
  0xcb   :  { %v113_v18 = vpop.f32.mrf.mxu0  ;;  %395 = vmatpush3.msra.mxu1 %v386_v17  ;;  %398 = vmatprep.mubr.msk.f32.mxu1 %vm138_vm1, %v363_v8 }
  0xcc   :  { %396 = vmatprep.subr.mxu1 %v113_v18 }
  0xcd   :  { %397 = vmatpush3.msra.mxu1 %v113_v18 }
  0xce   :  { %399 = vmatmul.mubr.msk.f32.vlgmr.msra.gmra.mxu1 %vm138_vm1, %v364_v10 }
 0x18a   :  { %v393_v29 = vpop.f32.mrf.mxu1 }
 0x18b   :  { %v322_v30 = vmul.f32 %v405_v27, %v393_v29 }
 0x18c   :  { %v211_v32 = vpop.f32.mrf.mxu1 }
 0x18d   :  { %412 = vtanh.f32 %v322_v30  ;;  %v321_v33 = vmul.f32 %v407_v28, %v211_v32 }
 0x18e   :  { %v400_v34 = vpop.f32.mrf.mxu1 }
 0x18f   :  { %414 = vtanh.f32 %v321_v33  ;;  %v324_v35 = vmul.f32 %v409_v31, %v400_v34 }
 0x190   :  { %v292_v37 = vpop.f32.mrf.mxu1 }
 0x191   :  { %416 = vtanh.f32 %v324_v35  ;;  %v323_v38 = vmul.f32 %v411_v36, %v292_v37 }
 0x193   :  { %418 = vtanh.f32 %v323_v38 }
 0x19a   :  { %v413_v39 = vpop.eup %412 }
 0x19b   :  { %330 = vst [vmem:[#allocation3 + $0x8] sm:$0xff] %v413_v39 }
 0x19c   :  { %v415_v40 = vpop.eup %414 }
 0x19d   :  { %329 = vst [vmem:[#allocation3] sm:$0xff] %v415_v40 }
 0x19e   :  { %v417_v41 = vpop.eup %416 }
 0x19f   :  { %332 = vst [vmem:[#allocation3 + $0x18] sm:$0xff] %v417_v41 }
 0x1a0   :  { %v419_v42 = vpop.eup %418 }
 0x1a1   :  { %331 = vst [vmem:[#allocation3 + $0x10] sm:$0xff] %v419_v42 }
 0x1a2   :  { %431 = shalt.err (!%p428_p4)
}
 0x1a3   :  { %s443_s26 = smov 128   ;;  %s444_s27 = smov 8  }
 0x1a4   :  { %344 = dma.vmem_to_hbm [thread:$0]  %s339_s1, 512, %s500_s3, [#allocation4], %s443_s26, %s443_s26, %s444_s27  }
 0x1a5   :  { %440 = dma.done.wait [#allocation4], 512  }
 0x1a6   :  { %441 = vsyncadd [#allocation4], 4294966784 }
 0x1a7   :  { %348 = vsyncpa [#allocation4], 1 }

// kernel: tpu_custom_call.1
= control target key start
LH: loop header
LB: loop body
LE: loop exit
PB: predicated region body
PF: predicated region fallthrough
CT: control target
= control target key end

     0   :  { %vm24_vm0 = vcmask 64512   ;;  %s497_s0 = inlined_call_operand.vmem [shape: bf16[2,16,16], index: 0, kind: input, shape index: {}]   ;;  %s498_s1 = inlined_call_operand.vmem [shape: f32[2,16,8], index: 1, kind: input, shape index: {}]   ;;  %s499_s2 = inlined_call_operand.vmem [shape: f32[8,128], index: 2, kind: input, shape index: {}]   ;;  %s500_s3 = inlined_call_operand.hbm [shape: f32[2,16,128], index: 3, kind: output, shape index: {}]  }
   0x1   :  { %v23_v0 = vld [vmem:[%s499_s2] sm:$0xff]  ;;  %v20_v2 = vld [vmem:[%s498_s1 + $0x8] sm:$0xff]  ;;  %v21_v3 = vld [vmem:[%s498_s1 + $0x10] sm:$0xff] }
   0x2   :  { %v19_v1 = vld [vmem:[%s498_s1] sm:$0xff]  ;;  %379 = vmatprep.subr.mxu0 %v23_v0 }
   0x3   :  { %381 = vmatprep.mubr.msk.f32.mxu0 %vm24_vm0, %v19_v1 }
   0x4   :  { %8 = vsyncpa [#allocation4], 0  ;;  %380 = vmatpush3.msra.mxu0 %v23_v0  ;;  %v22_v4 = vld [vmem:[%s498_s1 + $0x18] sm:$0xff]  ;;  %v358_v5 = vld [vmem:[%s497_s0] sm:$0xff]   ;;  %vm138_vm1 = vcmask 130048  }
   0x5   :  { %382 = vmatmul.mubr.msk.f32.vlgmr.msra.gmra.mxu0 %vm24_vm0, %v20_v2  ;;  %v359_v6 = vunpack.c.l.bf16 %v358_v5  ;;  %v365_v7 = vld [vmem:[%s497_s0 + $0x8] sm:$0xff]   ;;  %v360_v9 = vunpack.c.h.bf16 %v358_v5  ;;  %s442_s0 = smov [#allocation3]  }
   0x6   :  { %384 = vmatprep.mubr.msk.f32.mxu0 %vm24_vm0, %v21_v3  ;;  %v363_v8 = vunpack.c.l.bf16 %v365_v7  ;;  %v364_v10 = vunpack.c.h.bf16 %v365_v7  ;;  %s338_s1 = sshll.u32 %s442_s0, 4  ;;  %s339_s1 = int_to_ptr.vmem [resolvable:$true] %s338_s1 }
   0x7   :  { %391 = vmatprep.mubr.msk.f32.mxu1 %vm138_vm1, %v359_v6  ;;  %v301_v11 = vsel %vm138_vm1, %v359_v6, 0.0  ;;  %v304_v13 = vsel %vm138_vm1, %v360_v9, 0.0  ;;  %s420_s25 = scalar_lea.vmem %s339_s1, 512  ;;  %p425_p1 = scmp.lt.s32.totalorder %s339_s1, %s339_s1 }
   0x8   :  { %v307_v12 = vsel %vm138_vm1, %v363_v8, 0.0  ;;  %302 = vadd.xlane.f32.xlu0 %v301_v11  ;;  %v310_v14 = vsel %vm138_vm1, %v364_v10, 0.0  ;;  %p421_p0 = scmp.ne.s32.totalorder %s339_s1, %s420_s25  ;;  %p426_p2 = scmp.lt.s32.totalorder %s420_s25, %s420_s25 }
   0x9   :  { %385 = vmatmul.mubr.msk.f32.gmra.mxu0 %vm24_vm0, %v22_v4  ;;  %308 = vadd.xlane.f32.xlu1 %v307_v12 }
   0xa   :  { %p427_p3 = por %p426_p2, %p425_p1 }
   0xc   :  { %305 = vadd.xlane.f32.xlu0 %v304_v13  ;;  %p428_p4 = pnand %p427_p3, %p421_p0 }
   0xd   :  { %311 = vadd.xlane.f32.xlu1 %v310_v14 }
  0x91   :  { %v303_v19 = vpop.xlane.xlu0 %302 }
  0x92   :  { %v309_v20 = vpop.xlane.xlu1 %308  ;;  %v313_v24 = vadd.f32 1.0, %v303_v19 }
  0x93   :  { %v315_v26 = vadd.f32 1.0, %v309_v20 }
  0x95   :  { %v306_v21 = vpop.xlane.xlu0 %305 }
  0x96   :  { %v314_v22 = vadd.f32 1.0, %v306_v21  ;;  %v312_v23 = vpop.xlane.xlu1 %311 }
  0x97   :  { %v316_v25 = vadd.f32 1.0, %v312_v23 }
  0x98   :  { %404 = vrcp.f32 %v314_v22 }
  0x99   :  { %406 = vrcp.f32 %v313_v24 }
  0x9a   :  { %408 = vrcp.f32 %v316_v25 }
  0x9b   :  { %410 = vrcp.f32 %v315_v26 }
  0xa5   :  { %v405_v27 = vpop.eup %404 }
  0xa6   :  { %v407_v28 = vpop.eup %406 }
  0xa7   :  { %v409_v31 = vpop.eup %408 }
  0xa8   :  { %v411_v36 = vpop.eup %410 }
  0xc5   :  { %v383_v15 = vpop.f32.mrf.mxu0 }
  0xc6   :  { %387 = vmatprep.subr.mxu1 %v383_v15 }
  0xc7   :  { %v103_v16 = vpop.f32.mrf.mxu0  ;;  %388 = vmatpush3.msra.mxu1 %v383_v15 }
  0xc8   :  { %389 = vmatprep.subr.mxu1 %v103_v16 }
  0xc9   :  { %v386_v17 = vpop.f32.mrf.mxu0  ;;  %390 = vmatpush3.msra.mxu1 %v103_v16 }
  0xca   :  { %392 = vmatmul.mubr.msk.f32.vlgmr.msra.gmra.mxu1 %vm138_vm1, %v360_v9  ;;  %394 = vmatprep.subr.mxu1 %v386_v17 }
  0xcb   :  { %v113_v18 = vpop.f32.mrf.mxu0  ;;  %395 = vmatpush3.msra.mxu1 %v386_v17  ;;  %398 = vmatprep.mubr.msk.f32.mxu1 %vm138_vm1, %v363_v8 }
  0xcc   :  { %396 = vmatprep.subr.mxu1 %v113_v18 }
  0xcd   :  { %397 = vmatpush3.msra.mxu1 %v113_v18 }
  0xce   :  { %399 = vmatmul.mubr.msk.f32.vlgmr.msra.gmra.mxu1 %vm138_vm1, %v364_v10 }
 0x18a   :  { %v393_v29 = vpop.f32.mrf.mxu1 }
 0x18b   :  { %v322_v30 = vmul.f32 %v405_v27, %v393_v29 }
 0x18c   :  { %v211_v32 = vpop.f32.mrf.mxu1 }
 0x18d   :  { %412 = vtanh.f32 %v322_v30  ;;  %v321_v33 = vmul.f32 %v407_v28, %v211_v32 }
 0x18e   :  { %v400_v34 = vpop.f32.mrf.mxu1 }
 0x18f   :  { %414 = vtanh.f32 %v321_v33  ;;  %v324_v35 = vmul.f32 %v409_v31, %v400_v34 }
 0x190   :  { %v292_v37 = vpop.f32.mrf.mxu1 }
 0x191   :  { %416 = vtanh.f32 %v324_v35  ;;  %v323_v38 = vmul.f32 %v411_v36, %v292_v37 }
 0x193   :  { %418 = vtanh.f32 %v323_v38 }
 0x19a   :  { %v413_v39 = vpop.eup %412 }
 0x19b   :  { %330 = vst [vmem:[#allocation3 + $0x8] sm:$0xff] %v413_v39 }
 0x19c   :  { %v415_v40 = vpop.eup %414 }
 0x19d   :  { %329 = vst [vmem:[#allocation3] sm:$0xff] %v415_v40 }
 0x19e   :  { %v417_v41 = vpop.eup %416 }
 0x19f   :  { %332 = vst [vmem:[#allocation3 + $0x18] sm:$0xff] %v417_v41 }
 0x1a0   :  { %v419_v42 = vpop.eup %418 }
 0x1a1   :  { %331 = vst [vmem:[#allocation3 + $0x10] sm:$0xff] %v419_v42 }
 0x1a2   :  { %431 = shalt.err (!%p428_p4)
}
 0x1a3   :  { %s443_s26 = smov 128   ;;  %s444_s27 = smov 8  }
 0x1a4   :  { %344 = dma.vmem_to_hbm [thread:$0]  %s339_s1, 512, %s500_s3, [#allocation4], %s443_s26, %s443_s26, %s444_s27  }
 0x1a5   :  { %440 = dma.done.wait [#allocation4], 512  }
 0x1a6   :  { %441 = vsyncadd [#allocation4], 4294966784 }
 0x1a7   :  { %348 = vsyncpa [#allocation4], 1 }

</bundles_post_ra>
